<compile_context>
chip_gen: v7x
topology: tpu7x:2x2x1
jax: 0.10.0
libtpu: 0.0.40
codegen_flags: <defaults>
</compile_context>

<pallas_src>
import jax
import jax.numpy as jnp
from jax.experimental import pallas as pl
from jax.experimental.pallas import tpu as pltpu


def _round_up(x, m):
    return ((x + m - 1) // m) * m


def _vmem_budget_bytes():
    """~75% of physical per-core VMEM (generation aware); safe 48 MiB fallback."""
    try:
        cap = int(pltpu.get_tpu_info().vmem_capacity_bytes)
    except Exception:
        cap = 64 << 20  # unknown generation: assume v7x-sized VMEM
    return (cap * 3) // 4


def _make_mlp_kernel(num_layers, use_ln, true_dims, padded_dims, out_dtype, compute_dtype):
    """Kernel closure over static layer count / LN flag / true & padded feature dims."""
    per_layer = 4 if use_ln else 2

    def kernel(x_ref, *refs):
        # refs layout per layer i: w_i (Pin_i, Pout_i), b_i (1, Pout_i)
        #                          [, gamma_i (1, Pout_i), beta_i (1, Pout_i)]
        # last ref is the output tile.
        out_ref = refs[-1]
        params = refs[:-1]

        h = x_ref[...].astype(compute_dtype)
        for layer in range(num_layers):
            base = layer * per_layer
            w_ref = params[base]
            b = params[base + 1][...]                     # (1, Pout) f32, lane broadcast

            # Linear on the MXU: compute_dtype operands, f32 accumulation.
            h = jnp.dot(h, w_ref[...], preferred_element_type=jnp.float32) + b

            if use_ln:
                gamma = params[base + 2][...]             # (1, Pout) f32
                beta = params[base + 3][...]              # (1, Pout) f32
                dout = true_dims[layer + 1]
                pout = padded_dims[layer + 1]
                inv_d = jnp.float32(1.0 / dout)
                # Padded lanes of h are exact zeros, so the full-lane sum / true count
                # gives the exact mean.
                mean = jnp.sum(h, axis=-1, keepdims=True) * inv_d
                centered = h - mean
                if pout != dout:
                    # Mask padded lanes (which became -mean) so they do not pollute the
                    # centered, numerically-safe variance.
                    lane = jax.lax.broadcasted_iota(jnp.int32, (1, pout), 1)
                    centered = jnp.where(lane < dout, centered, 0.0)
                var = jnp.sum(centered * centered, axis=-1, keepdims=True) * inv_d
                inv_std = jax.lax.rsqrt(var + 1e-5)
                # gamma/beta padded lanes are zero -> padded output lanes stay exactly zero.
                h = centered * inv_std * gamma + beta

            # ReLU activation (f32 epilogue). Dropout with rate=0 / eval mode is identity.
            h = jnp.maximum(h, 0.0)
            if layer + 1 < num_layers:
                h = h.astype(compute_dtype)               # narrow activations between layers
        out_ref[...] = h.astype(out_dtype)

    return kernel


def mlp_pallas(x, weights, biases, ln_params=None, *, tile_m=256,
               compute_dtype=jnp.bfloat16, dropout_rate=0.0):
    """Fused MLP forward.

    x:         (B, D_in) float32
    weights:   list of (Din_i, Dout_i)  (already transposed from torch's (out, in))
    biases:    list of (Dout_i,)
    ln_params: optional list of (gamma, beta) pairs, each (Dout_i,)
    compute_dtype: matmul operand dtype (bf16 default; MXU accumulates in f32 and the
                   LayerNorm/ReLU epilogue stays f32).
    """
    if dropout_rate != 0.0:
        # TODO(synk): training-mode dropout with the on-chip PRNG.
        raise NotImplementedError("only dropout_rate=0 (eval mode) is supported")

    B, d_in = x.shape
    num_layers = len(weights)
    if num_layers == 0:
        raise ValueError("hidden_units is empty!!")
    use_ln = ln_params is not None

    dims = [d_in] + [int(w.shape[1]) for w in weights]    # true feature dims
    pdims = [_round_up(d, 128) for d in dims]             # lane-dense (128-mult) dims

    # Balanced batch tiles; >= 2 grid steps whenever B allows so both v7x TCs get work.
    n_tiles = pl.cdiv(B, int(tile_m))
    if B > 8:
        n_tiles = max(n_tiles, 2)
    tile_m_eff = _round_up(pl.cdiv(B, n_tiles), 8)
    grid_m = pl.cdiv(B, tile_m_eff)
    grid = (grid_m,)

    # Pad only the feature dim (zeros); the ragged batch tail is handled by Pallas's
    # masked partial blocks (per-row ops never mix rows), avoiding an extra HBM round trip.
    x_p = x if pdims[0] == d_in else jnp.pad(x, ((0, 0), (0, pdims[0] - d_in)))

    # Flatten (padded) params into the positional-arg order expected by the kernel.
    flat_params, param_shapes = [], []
    for i in range(num_layers):
        din, dout = dims[i], dims[i + 1]
        pin, pout = pdims[i], pdims[i + 1]
        w_p = jnp.pad(weights[i].astype(compute_dtype),
                      ((0, pin - din), (0, pout - dout)))
        b_p = jnp.pad(biases[i].astype(jnp.float32), (0, pout - dout)).reshape(1, pout)
        flat_params += [w_p, b_p]
        param_shapes += [(pin, pout), (1, pout)]
        if use_ln:
            g_p = jnp.pad(ln_params[i][0].astype(jnp.float32),
                          (0, pout - dout)).reshape(1, pout)
            t_p = jnp.pad(ln_params[i][1].astype(jnp.float32),
                          (0, pout - dout)).reshape(1, pout)
            flat_params += [g_p, t_p]
            param_shapes += [(1, pout), (1, pout)]

    kernel = _make_mlp_kernel(num_layers, use_ln, tuple(dims), tuple(pdims),
                              x.dtype, compute_dtype)

    # Cost model: helps XLA schedule the surrounding graph around the custom call.
    rows = grid_m * tile_m_eff
    flops = 2 * rows * sum(pdims[i] * pdims[i + 1] for i in range(num_layers))
    param_bytes = sum(int(p.size) * p.dtype.itemsize for p in flat_params)
    io_bytes = (int(x_p.size) * x_p.dtype.itemsize
                + B * pdims[-1] * jnp.dtype(x.dtype).itemsize)
    cost = pl.CostEstimate(flops=flops,
                           transcendentals=(rows * num_layers) if use_ln else 0,
                           bytes_accessed=param_bytes + io_bytes)

    # VMEM: resident params (x2 margin in case the Buffered(1) request is rejected) +
    # double-buffered I/O tiles + intermediates + headroom, capped at the per-generation
    # budget (~48 MiB on v7x, ~96 MiB on v5e/v6e).
    act_bytes = 4 * tile_m_eff * (2 * (pdims[0] + pdims[-1]) + 3 * max(pdims))
    budget = _vmem_budget_bytes()
    need = 2 * param_bytes + act_bytes + (8 << 20)
    vmem_limit = int(min(max(need, 32 << 20), budget))
    # TODO(synk): if param_bytes alone exceeds `budget`, stream the big weights from HBM
    # instead of keeping them all resident (memory_space=pl.ANY + pltpu.emit_pipeline).

    compiler_params = pltpu.CompilerParams(
        dimension_semantics=("parallel",),     # batch axis shards across TCs (megacore)
        vmem_limit_bytes=vmem_limit)

    out_shape = jax.ShapeDtypeStruct((B, pdims[-1]), x.dtype)

    def build_call(param_pipeline_mode):
        spec_kwargs = ({} if param_pipeline_mode is None
                       else {"pipeline_mode": param_pipeline_mode})
        in_specs = [pl.BlockSpec((tile_m_eff, pdims[0]), lambda i: (i, 0))]
        in_specs += [pl.BlockSpec(shape, lambda i: (0, 0), **spec_kwargs)
                     for shape in param_shapes]
        out_spec = pl.BlockSpec((tile_m_eff, pdims[-1]), lambda i: (i, 0))
        return pl.pallas_call(
            kernel,
            out_shape=out_shape,
            grid_spec=pltpu.PrefetchScalarGridSpec(
                num_scalar_prefetch=0,
                grid=grid,
                in_specs=in_specs,
                out_specs=out_spec),
            compiler_params=compiler_params,
            cost_estimate=cost)

    try:
        # Parameters are grid-invariant (index_map always (0, 0)); single-buffer them so
        # each weight occupies VMEM once instead of twice.
        out_p = build_call(pl.Buffered(1))(x_p, *flat_params)
    except (TypeError, ValueError, NotImplementedError, pltpu.LoweringException):
        # Only pipeline_mode / lowering rejections fall back to the default pipeline mode;
        # a genuine VMEM OOM (which double-buffered params would only worsen) still raises.
        out_p = build_call(None)(x_p, *flat_params)

    return out_p if pdims[-1] == dims[-1] else out_p[:, :dims[-1]]


def init_mlp_params(key, inputs_dim, hidden_units, init_std=1e-4, use_ln=False):
    """Deterministic init matching the torch module: weight ~ Normal(0, init_std);
    bias keeps torch Linear default U(-1/sqrt(fan_in), +); LN weight=1, bias=0."""
    dims = [inputs_dim] + list(hidden_units)
    weights, biases, ln_params = [], [], []
    for i in range(len(hidden_units)):
        fan_in, fan_out = dims[i], dims[i + 1]
        key, kw, kb = jax.random.split(key, 3)
        w = init_std * jax.random.normal(kw, (fan_in, fan_out), dtype=jnp.float32)
        bound = 1.0 / jnp.sqrt(jnp.float32(fan_in))
        b = jax.random.uniform(kb, (fan_out,), dtype=jnp.float32,
                               minval=-bound, maxval=bound)
        weights.append(w)
        biases.append(b)
        if use_ln:
            ln_params.append((jnp.ones((fan_out,), jnp.float32),
                              jnp.zeros((fan_out,), jnp.float32)))
    return weights, biases, (ln_params if use_ln else None)


def mlp_reference(x, weights, biases, ln_params=None):
    """Plain-JAX reference of the torch forward pass (relu, eval-mode dropout)."""
    h = x
    for i in range(len(weights)):
        h = h @ weights[i] + biases[i]
        if ln_params is not None:
            g, bt = ln_params[i]
            mean = jnp.mean(h, axis=-1, keepdims=True)
            var = jnp.mean((h - mean) ** 2, axis=-1, keepdims=True)
            h = (h - mean) * jax.lax.rsqrt(var + 1e-5) * g + bt
        h = jnp.maximum(h, 0.0)
    return h


if __name__ == "__main__":
    # Small shapes consistent with the module: 2D input (batch, input_dim).
    batch = 16
    inputs_dim = 16
    hidden_units = [32, 32]

    key = jax.random.PRNGKey(0)
    key, kx = jax.random.split(key)
    x = jax.random.normal(kx, (batch, inputs_dim), dtype=jnp.float32)

    # Config 1: module defaults (relu, no LN, dropout=0), f32 MXU operands -> tight check.
    w, b, _ = init_mlp_params(key, inputs_dim, hidden_units, init_std=1e-4, use_ln=False)
    ref = mlp_reference(x, w, b, None)
    out_f32 = jax.block_until_ready(mlp_pallas(x, w, b, None, compute_dtype=jnp.float32))
    assert out_f32.shape == (batch, hidden_units[-1])
    assert jnp.allclose(out_f32, ref, atol=1e-5, rtol=1e-5), "f32 MLP mismatch vs reference"

    # Config 2: default bf16 MXU operands (MXU-native), f32 accumulate/epilogue -> loose check.
    out_bf16 = jax.block_until_ready(mlp_pallas(x, w, b, None))
    assert jnp.allclose(out_bf16, ref, atol=2e-2, rtol=2e-2), "bf16 MLP mismatch vs reference"

    # Config 3: use_ln=True (LayerNorm before activation), f32 for a tight check.
    w2, b2, ln2 = init_mlp_params(key, inputs_dim, hidden_units, init_std=1e-4, use_ln=True)
    ref_ln = mlp_reference(x, w2, b2, ln2)
    out_ln = jax.block_until_ready(
        mlp_pallas(x, w2, b2, ln2, compute_dtype=jnp.float32, tile_m=128))
    assert jnp.allclose(out_ln, ref_ln, atol=1e-4, rtol=1e-4), "LN MLP mismatch vs reference"

    print("KERNEL_OK")
</pallas_src>

<mosaic_0001>
module attributes {stable_mosaic.version = 11 : i64} {
  func.func @kernel(%arg0: i32, %arg1: memref<8x128xf32, #tpu.memory_space<vmem>>, %arg2: memref<128x128xf32, #tpu.memory_space<vmem>>, %arg3: memref<1x128xf32, #tpu.memory_space<vmem>>, %arg4: memref<128x128xf32, #tpu.memory_space<vmem>>, %arg5: memref<1x128xf32, #tpu.memory_space<vmem>>, %arg6: memref<8x128xf32, #tpu.memory_space<vmem>>) attributes {dimension_semantics = [#tpu.dimension_semantics<parallel>], iteration_bounds = array<i64: 2>, scalar_prefetch = 0 : i64, scratch_operands = 0 : i64, tpu.core_type = #tpu.core_type<tc>, window_params = [{transform_indices = @transform_0, window_bounds = array<i64: 8, 128>}, {pipeline_mode = #tpu.pipeline_mode<synchronous>, transform_indices = @transform_1, window_bounds = array<i64: 128, 128>}, {pipeline_mode = #tpu.pipeline_mode<synchronous>, transform_indices = @transform_2, window_bounds = array<i64: 1, 128>}, {pipeline_mode = #tpu.pipeline_mode<synchronous>, transform_indices = @transform_3, window_bounds = array<i64: 128, 128>}, {pipeline_mode = #tpu.pipeline_mode<synchronous>, transform_indices = @transform_4, window_bounds = array<i64: 1, 128>}, {transform_indices = @transform_5, window_bounds = array<i64: 8, 128>}]} {
    %c0 = arith.constant 0 : index
    %c0_0 = arith.constant 0 : index
    %0 = vector.load %arg1[%c0, %c0_0] : memref<8x128xf32, #tpu.memory_space<vmem>>, vector<8x128xf32>
    %c0_1 = arith.constant 0 : index
    %c0_2 = arith.constant 0 : index
    %1 = vector.load %arg3[%c0_1, %c0_2] : memref<1x128xf32, #tpu.memory_space<vmem>>, vector<1x128xf32>
    %c0_3 = arith.constant 0 : index
    %c0_4 = arith.constant 0 : index
    %2 = vector.load %arg2[%c0_3, %c0_4] : memref<128x128xf32, #tpu.memory_space<vmem>>, vector<128x128xf32>
    %cst = arith.constant dense<0.000000e+00> : vector<8x128xf32>
    %3 = tpu.matmul %0, %2, %cst {dimension_numbers = #tpu.dot_dimension_numbers<[1], [0], [0], [1], [0, 0, 1, 1], [], []>} : vector<8x128xf32>, vector<128x128xf32>, vector<8x128xf32> -> vector<8x128xf32>
    %4 = vector.broadcast %1 : vector<1x128xf32> to vector<8x128xf32>
    %5 = arith.addf %3, %4 : vector<8x128xf32>
    %cst_5 = arith.constant 0.000000e+00 : f32
    %6 = vector.broadcast %cst_5 : f32 to vector<8x128xf32>
    %7 = arith.maximumf %5, %6 : vector<8x128xf32>
    %c0_6 = arith.constant 0 : index
    %c0_7 = arith.constant 0 : index
    %8 = vector.load %arg5[%c0_6, %c0_7] : memref<1x128xf32, #tpu.memory_space<vmem>>, vector<1x128xf32>
    %c0_8 = arith.constant 0 : index
    %c0_9 = arith.constant 0 : index
    %9 = vector.load %arg4[%c0_8, %c0_9] : memref<128x128xf32, #tpu.memory_space<vmem>>, vector<128x128xf32>
    %cst_10 = arith.constant dense<0.000000e+00> : vector<8x128xf32>
    %10 = tpu.matmul %7, %9, %cst_10 {dimension_numbers = #tpu.dot_dimension_numbers<[1], [0], [0], [1], [0, 0, 1, 1], [], []>} : vector<8x128xf32>, vector<128x128xf32>, vector<8x128xf32> -> vector<8x128xf32>
    %11 = vector.broadcast %8 : vector<1x128xf32> to vector<8x128xf32>
    %12 = arith.addf %10, %11 : vector<8x128xf32>
    %cst_11 = arith.constant 0.000000e+00 : f32
    %13 = vector.broadcast %cst_11 : f32 to vector<8x128xf32>
    %14 = arith.maximumf %12, %13 : vector<8x128xf32>
    %c0_12 = arith.constant 0 : index
    %c0_13 = arith.constant 0 : index
    %15 = vector.load %arg6[%c0_12, %c0_13] : memref<8x128xf32, #tpu.memory_space<vmem>>, vector<8x128xf32>
    tpu.vector_store %arg6[%c0_12, %c0_13], %14 {strides = array<i32>} : memref<8x128xf32, #tpu.memory_space<vmem>>, vector<8x128xf32>,
    return
  }
  func.func @transform_0(%arg0: i32) -> (i32, i32) {
    %c0_i32 = arith.constant 0 : i32
    %c0_i32_0 = arith.constant 0 : i32
    return %arg0, %c0_i32 : i32, i32
  }
  func.func @transform_1(%arg0: i32) -> (i32, i32) {
    %c0_i32 = arith.constant 0 : i32
    %c0_i32_0 = arith.constant 0 : i32
    %c0_i32_1 = arith.constant 0 : i32
    return %c0_i32, %c0_i32_0 : i32, i32
  }
  func.func @transform_2(%arg0: i32) -> (i32, i32) {
    %c0_i32 = arith.constant 0 : i32
    %c0_i32_0 = arith.constant 0 : i32
    %c0_i32_1 = arith.constant 0 : i32
    return %c0_i32, %c0_i32_0 : i32, i32
  }
  func.func @transform_3(%arg0: i32) -> (i32, i32) {
    %c0_i32 = arith.constant 0 : i32
    %c0_i32_0 = arith.constant 0 : i32
    %c0_i32_1 = arith.constant 0 : i32
    return %c0_i32, %c0_i32_0 : i32, i32
  }
  func.func @transform_4(%arg0: i32) -> (i32, i32) {
    %c0_i32 = arith.constant 0 : i32
    %c0_i32_0 = arith.constant 0 : i32
    %c0_i32_1 = arith.constant 0 : i32
    return %c0_i32, %c0_i32_0 : i32, i32
  }
  func.func @transform_5(%arg0: i32) -> (i32, i32) {
    %c0_i32 = arith.constant 0 : i32
    %c0_i32_0 = arith.constant 0 : i32
    return %arg0, %c0_i32 : i32, i32
  }
}

</mosaic_0001>

<bundles_post_ra>
// kernel: tpu_custom_call.1
= control target key start
LH: loop header
LB: loop body
LE: loop exit
PB: predicated region body
PF: predicated region fallthrough
CT: control target
= control target key end

     0   :  { %10 = vsyncpa [#allocation3], 0  ;;  %s1259_s0 = inlined_call_operand.hbm [shape: f32[16,128], index: 0, kind: input, shape index: {}]   ;;  %s1260_s1 = inlined_call_operand.hbm [shape: f32[128,128], index: 1, kind: input, shape index: {}]   ;;  %s1261_s2 = inlined_call_operand.vmem [shape: f32[1,128], index: 2, kind: input, shape index: {}]   ;;  %s1262_s3 = inlined_call_operand.hbm [shape: f32[128,128], index: 3, kind: input, shape index: {}]   ;;  %s1263_s4 = inlined_call_operand.vmem [shape: f32[1,128], index: 4, kind: input, shape index: {}]   ;;  %s1264_s5 = inlined_call_operand.hbm [shape: f32[16,128], index: 5, kind: output, shape index: {}]  }
   0x1   :  { %12 = vsyncpa [#allocation3 + $0x1], 0 }
   0x2   :  { %13 = vsyncpa [#allocation6], 0 }
   0x3   :  { %14 = vsyncpa [#allocation4], 0 }
   0x4   :  { %16 = vsyncpa [#allocation4 + $0x1], 0  ;;  %s1001_s18 = smov 0   ;;  %s1003_s19 = smov 0  }
   0x5   :  { %s1005_s20 = smov 0   ;;  %s1007_s21 = smov 0  }
   0x6 LB: > { %s1022_s22 = sadd.s32 4294967295, %s960_s21   ;;  %s562_s23 = sadd.s32 4294967294, %s960_s21   ;;  %s960_s21 = sphi %s1007_s21, %s1284_s21   ;;  %s956_s20 = sphi %s1005_s20, %s1283_s20   ;;  %s952_s19 = sphi %s1003_s19, %s1282_s19   ;;  %s948_s18 = sphi %s1001_s18, %s1281_s18  }
   0x7   : > { %p42_p0 = scmp.ne.s32.totalorder %s952_s19, %s948_s18  ;;  %p1265_p1 = scmp.eq.s32.totalorder %s1022_s22, 0 }
   0x8   : > { %p156_p3 = scmp.eq.s32.totalorder %s562_s23, 1  ;;  %p563_p5 = scmp.ge.s32.totalorder %s960_s21, 1 }
   0x9   : > { %p1031_p4 = por %p1265_p1, %p42_p0  ;;  %p163_p7 = scmp.lt.s32.totalorder %s960_s21, 3 }
   0xa   : > { %p1036_p6 = por %p156_p3, %p42_p0  ;;  %s962_s27 = smov [#allocation5]  }
   0xb   : > { %s1268_s24 = scalar_select %p1031_p4, 1, 0 }
   0xc   : > { %s1269_s25 = scalar_select %p1036_p6, 1, 0 }
   0xd   : > { %p1041_p8 = pnand %p563_p5, %p163_p7  ;;  %s175_s28 = sshll.u32 %s962_s27, 4  ;;  %s1045_s28 = int_to_ptr.vmem [resolvable:$true] %s175_s28 }
   0xe   : > { %s963_s30 = smov [#allocation7]   ;;  %s804_s9 = scalar_lea.hbm %s1260_s1, 2048 }
   0xf   : > { %p744_p9 = pneg %p1041_p8  ;;  %s191_s6 = sshll.u32 %s963_s30, 4  ;;  %s1056_s6 = int_to_ptr.vmem [resolvable:$true] %s191_s6 }
  0x10   : > { %p805_p12 = scmp.ne.s32.totalorder %s1260_s1, %s804_s9  ;;  %p811_p5 = scmp.lt.u32.totalorder %s804_s9, %s1260_s1 }
  0x11   : > { %p1052_p11 = pnand %p744_p9, %p1265_p1 }
  0x13   : > { %p806_p13 = pneg %p1052_p11 }
  0x15   : > { %p807_p0 = pnand %p806_p13, %p805_p12 }
  0x17   : > { %p808_p3 = pneg %p807_p0 }
  0x19   : > { %p813_p7 = pnand %p811_p5, %p808_p3 }
  0x1b   : > { %816 = shalt.err (!%p813_p7)
}
  0x1c   : > { %s817_s14 = scalar_lea.vmem %s1045_s28, 2048  ;;  %p825_p2 = scmp.lt.s32.totalorder %s1045_s28, %s1045_s28 }
  0x1d   : > { %p818_p9 = scmp.ne.s32.totalorder %s1045_s28, %s817_s14  ;;  %p826_p12 = scmp.lt.s32.totalorder %s817_s14, %s817_s14 }
  0x1f   : > { %p820_p10 = pnand %p818_p9, %p806_p13  ;;  %p827_p0 = por %p826_p12, %p825_p2 }
  0x21   : > { %p821_p1 = pneg %p820_p10 }
  0x23   : > { %p828_p6 = pnand %p827_p0, %p821_p1 }
  0x25   : > { %831 = shalt.err (!%p828_p6)
}
  0x26   : > { %s964_s15 = smov 128   ;;  %s965_s16 = smov 8  }
  0x27   : > { %747 = dma.hbm_to_vmem [thread:$0]  (!%p1052_p11), %s1260_s1, 2048, %s1045_s28, [#allocation6], %s964_s15, %s964_s15, %s965_s16  }
  0x28   : > { %s832_s7 = scalar_lea.hbm %s1262_s3, 2048 }
  0x29   : > { %p833_p2 = scmp.ne.s32.totalorder %s1262_s3, %s832_s7  ;;  %p839_p10 = scmp.lt.u32.totalorder %s832_s7, %s1262_s3 }
  0x2b   : > { %p835_p1 = pnand %p833_p2, %p806_p13 }
  0x2d   : > { %p836_p6 = pneg %p835_p1 }
  0x2f   : > { %p841_p3 = pnand %p839_p10, %p836_p6 }
  0x31   : > { %844 = shalt.err (!%p841_p3)
}
  0x32   : > { %s845_s28 = scalar_lea.vmem %s1056_s6, 2048  ;;  %p853_p12 = scmp.lt.s32.totalorder %s1056_s6, %s1056_s6 }
  0x33   : > { %p846_p5 = scmp.ne.s32.totalorder %s1056_s6, %s845_s28  ;;  %p854_p0 = scmp.lt.s32.totalorder %s845_s28, %s845_s28 }
  0x35   : > { %p848_p7 = pnand %p846_p5, %p806_p13  ;;  %p855_p2 = por %p854_p0, %p853_p12 }
  0x37   : > { %p849_p9 = pneg %p848_p7 }
  0x39   : > { %p856_p1 = pnand %p855_p2, %p849_p9 }
  0x3b   : > { %859 = shalt.err (!%p856_p1)
}
  0x3c   : > { %750 = dma.hbm_to_vmem [thread:$0]  (!%p1052_p11), %s1262_s3, 2048, %s1056_s6, [#allocation6], %s964_s15, %s964_s15, %s965_s16  }
  0x3d   : > { %s1111_s14 = sadd.s32 1, %s960_s21   ;;  %s29_s29 = sadd.s32 1, %s956_s20 }
  0x3e   : > { %s26_s17 = ssub.s32 %s960_s21, %s1111_s14  ;;  %p36_p13 = scmp.ne.s32.totalorder %s956_s20, %s952_s19 }
  0x3f   : > { %p27_p6 = scmp.eq.s32.totalorder %s26_s17, 0  ;;  %p37_p10 = scmp.eq.s32.totalorder %s960_s21, 0 }
  0x40   : > { %p1272_p3 = scmp.eq.s32.totalorder %s1022_s22, 1  ;;  %p761_p7 = scmp.lt.s32.totalorder %s960_s21, 2 }
  0x41   : > { %s1127_s27 = scalar_select %p27_p6, %s956_s20, %s29_s29  }
  0x42   : > { %p1121_p5 = por %p1272_p3, %p36_p13  ;;  %p38_p9 = por %p37_p10, %p36_p13 }
  0x43   : > { %s208_s30 = sand.u32 1, %s956_s20   ;;  %s568_s6 = sshll.u32 %s960_s21, 7 }
  0x44   : > { %s1273_s23 = scalar_select %p1121_p5, 1, 0 }
  0x45   : > { %s567_s7 = sshll.u32 %s208_s30, 3  ;;  %s1134_s8 = scalar_lea.hbm %s1259_s0, %s568_s6 }
  0x46   : > { %s212_s9 = scalar_lea.vmem [#allocation2], %s567_s7  ;;  %p1138_p11 = pnand %p761_p7, %p38_p9 }
  0x47   : > { %s219_s10 = sshll.u32 %s212_s9, 4  ;;  %s209_s28 = scalar_lea.sflag [#allocation3], %s208_s30  ;;  %s1136_s10 = int_to_ptr.vmem [resolvable:$true] %s219_s10 }
  0x48   : > { %s860_s12 = scalar_lea.hbm %s1134_s8, 128  ;;  %p862_p0 = pneg %p1138_p11 }
  0x49   : > { %p861_p12 = scmp.ne.s32.totalorder %s1134_s8, %s860_s12  ;;  %s865_s17 = scalar_lea.hbm %s1259_s0, 256 }
  0x4a   : > { %p866_p13 = scmp.lt.u32.totalorder %s1134_s8, %s1259_s0  ;;  %p867_p6 = scmp.lt.u32.totalorder %s865_s17, %s860_s12 }
  0x4b   : > { %p863_p2 = pnand %p862_p0, %p861_p12  ;;  %p869_p3 = scmp.lt.u32.totalorder %s860_s12, %s1134_s8 }
  0x4c   : > { %p868_p10 = por %p867_p6, %p866_p13 }
  0x4d   : > { %p864_p1 = pneg %p863_p2 }
  0x4e   : > { %p870_p7 = por %p869_p3, %p868_p10 }
  0x50   : > { %p871_p9 = pnand %p870_p7, %p864_p1 }
  0x52   : > { %874 = shalt.err (!%p871_p9)
}
  0x53   : > { %s875_s30 = scalar_lea.vmem %s1136_s10, 128  ;;  %s966_s15 = smov [#allocation2]  }
  0x54   : > { %p876_p12 = scmp.ne.s32.totalorder %s1136_s10, %s875_s30  ;;  %s880_s16 = sshll.u32 %s966_s15, 4  ;;  %s881_s16 = int_to_ptr.vmem [resolvable:$false] %s880_s16 }
  0x55   : > { %s882_s9 = scalar_lea.vmem %s881_s16, 256  ;;  %p883_p4 = scmp.lt.s32.totalorder %s1136_s10, %s881_s16 }
  0x56   : > { %p878_p2 = pnand %p876_p12, %p862_p0  ;;  %p884_p13 = scmp.lt.s32.totalorder %s882_s9, %s875_s30 }
  0x58   : > { %p879_p5 = pneg %p878_p2  ;;  %p885_p6 = por %p884_p13, %p883_p4 }
  0x5a   : > { %p886_p10 = pnand %p885_p6, %p879_p5 }
  0x5c   : > { %889 = shalt.err (!%p886_p10)
}
  0x5d   : > { %754 = dma.hbm_to_vmem [thread:$0]  (!%p1138_p11), %s1134_s8, 128, %s1136_s10, %s209_s28  }
  0x5e   : > { %228 = sbr.rel (%p1041_p8) target bundleno = 585 (0x249), region = 40  ;;  %s1170_s12 = sand.u32 (!%p1041_p8), 1, %s952_s19  }
  0x5f   : > { %s570_s13 = sshll.u32 (!%p1041_p8), %s1170_s12, 3  ;;  %s231_s29 = scalar_lea.sflag (!%p1041_p8), [#allocation3], %s1170_s12 }
  0x60   : > { %s1176_s17 = scalar_lea.vmem (!%p1041_p8), [#allocation2], %s570_s13  ;;  %p1275_p4 = scmp.ne.s32.totalorder (!%p1041_p8), %s1268_s24, 0 }
  0x65   : > { %935 = dma.done.wait (%p1275_p4), %s231_s29, 128  }
  0x66   : > { %937 = vsyncadd (%p1275_p4), %s231_s29, 4294967168  ;;  %p1276_p5 = scmp.eq.s32.totalorder %s1022_s22, 0 }
  0x68   : > { %939 = dma.done.wait (%p1276_p5), [#allocation6], 4096   ;;  %p1277_p8 = pmov %p1276_p5 }
  0x69   : > { %v967_v0 = vmov 0.0|0.0   ;;  %vm968_vm0 = vmmov 0   ;;  %v969_v1 = vmov 0.0   ;;  %v271_v2 = vld [vmem:[#allocation5] sm:$0xff]  ;;  %v272_v3 = vld [vmem:[#allocation5 + $0x8] sm:$0xff]  ;;  %v273_v4 = vld [vmem:[#allocation5 + $0x10] sm:$0xff] }
  0x6a   : > { %941 = vsyncadd (%p1277_p8), [#allocation6], 4294963200  ;;  %684 = vmatprep.subr.bf16.mxu0 %v967_v0  ;;  %646 = vmatprep.mubr.msk.f32.mxu0 %vm968_vm0, %v969_v1  ;;  %v685_v5 = vpack.c.bf16 %v272_v3, %v271_v2  ;;  %v274_v6 = vld [vmem:[#allocation5 + $0x18] sm:$0xff]  ;;  %v275_v8 = vld [vmem:[#allocation5 + $0x20] sm:$0xff]  ;;  %s577_s11 = sshll.u32 %s1022_s22, 7  ;;  %s268_s28 = scalar_lea.vmem [#allocation8], %s570_s13 }
  0x6b   : > { %708 = vmatprep.subr.bf16.mxu1 %v967_v0  ;;  %681 = vmatprep.mubr.msk.f32.mxu1 %vm968_vm0, %v969_v1  ;;  %v688_v7 = vpack.c.bf16 %v274_v6, %v273_v4  ;;  %v276_v9 = vld [vmem:[#allocation5 + $0x28] sm:$0xff]  ;;  %v365_v10 = vld [vmem:[#allocation7] sm:$0xff]  ;;  %v367_v12 = vld [vmem:[#allocation7 + $0x10] sm:$0xff]  ;;  %s473_s7 = sshll.u32 %s268_s28, 4  ;;  %s1215_s15 = scalar_lea.hbm %s1264_s5, %s577_s11  ;;  %s1217_s7 = int_to_ptr.vmem [resolvable:$true] %s473_s7 }
  0x6c   : > { %686 = vmatpush3.bf16.msra.mxu0 %v685_v5  ;;  %v366_v11 = vld [vmem:[#allocation7 + $0x8] sm:$0xff]  ;;  %v368_v13 = vld [vmem:[#allocation7 + $0x18] sm:$0xff]  ;;  %v691_v14 = vpack.c.bf16 %v276_v9, %v275_v8  ;;  %v277_v16 = vld [vmem:[#allocation5 + $0x30] sm:$0xff]  ;;  %s460_s16 = scalar_lea.sflag [#allocation4], %s1170_s12  ;;  %s890_s9 = scalar_lea.vmem %s1217_s7, 128 }
  0x6d   : > { %687 = vmatprep.subr.bf16.mxu0 %v967_v0  ;;  %v709_v15 = vpack.c.bf16 %v366_v11, %v365_v10  ;;  %v278_v17 = vld [vmem:[#allocation5 + $0x38] sm:$0xff]  ;;  %v712_v18 = vpack.c.bf16 %v368_v13, %v367_v12  ;;  %v369_v19 = vld [vmem:[#allocation7 + $0x20] sm:$0xff]  ;;  %v370_v20 = vld [vmem:[#allocation7 + $0x28] sm:$0xff]  ;;  %p891_p11 = scmp.ne.s32.totalorder %s1217_s7, %s890_s9  ;;  %p1278_p0 = scmp.ne.s32.totalorder %s1273_s23, 0 }
  0x6e   : > { %v694_v21 = vpack.c.bf16 %v278_v17, %v277_v16  ;;  %v279_v22 = vld [vmem:[#allocation5 + $0x40] sm:$0xff]  ;;  %v280_v23 = vld [vmem:[#allocation5 + $0x48] sm:$0xff]  ;;  %v715_v24 = vpack.c.bf16 %v370_v20, %v369_v19  ;;  %v371_v25 = vld [vmem:[#allocation7 + $0x30] sm:$0xff]  ;;  %s970_s22 = smov [#allocation8]  }
  0x6f   : > { %710 = vmatpush3.bf16.msra.mxu1 %v709_v15  ;;  %v372_v26 = vld [vmem:[#allocation7 + $0x38] sm:$0xff]  ;;  %v697_v27 = vpack.c.bf16 %v280_v23, %v279_v22  ;;  %v281_v28 = vld [vmem:[#allocation5 + $0x50] sm:$0xff]  ;;  %v373_v31 = vld [vmem:[#allocation7 + $0x40] sm:$0xff]  ;;  %p892_p1 = pnand %p891_p11, %p1278_p0  ;;  %s894_s13 = sshll.u32 %s970_s22, 4  ;;  %s895_s13 = int_to_ptr.vmem [resolvable:$false] %s894_s13 }
  0x70   : > { %689 = vmatpush3.bf16.msra.mxu0 %v688_v7  ;;  %711 = vmatprep.subr.bf16.mxu1 %v967_v0  ;;  %v282_v29 = vld [vmem:[#allocation5 + $0x58] sm:$0xff]  ;;  %v718_v30 = vpack.c.bf16 %v372_v26, %v371_v25  ;;  %v374_v32 = vld [vmem:[#allocation7 + $0x48] sm:$0xff]  ;;  %v283_v34 = vld [vmem:[#allocation5 + $0x60] sm:$0xff]  ;;  %s896_s29 = scalar_lea.vmem %s895_s13, 256  ;;  %p897_p7 = scmp.lt.s32.totalorder %s1217_s7, %s895_s13 }
  0x71   : > { %690 = vmatprep.subr.bf16.mxu0 %v967_v0  ;;  %v700_v33 = vpack.c.bf16 %v282_v29, %v281_v28  ;;  %v284_v35 = vld [vmem:[#allocation5 + $0x68] sm:$0xff]  ;;  %v721_v36 = vpack.c.bf16 %v374_v32, %v373_v31  ;;  %v375_v37 = vld [vmem:[#allocation7 + $0x50] sm:$0xff]  ;;  %v376_v38 = vld [vmem:[#allocation7 + $0x58] sm:$0xff]  ;;  %p893_p3 = pneg %p892_p1  ;;  %p898_p9 = scmp.lt.s32.totalorder %s896_s29, %s890_s9 }
  0x72   : > { %v703_v39 = vpack.c.bf16 %v284_v35, %v283_v34  ;;  %v285_v40 = vld [vmem:[#allocation5 + $0x70] sm:$0xff]  ;;  %v286_v41 = vld [vmem:[#allocation5 + $0x78] sm:$0xff]  ;;  %v724_v42 = vpack.c.bf16 %v376_v38, %v375_v37  ;;  %v377_v43 = vld [vmem:[#allocation7 + $0x60] sm:$0xff] }
  0x73   : > { %713 = vmatpush3.bf16.msra.mxu1 %v712_v18  ;;  %v378_v44 = vld [vmem:[#allocation7 + $0x68] sm:$0xff]  ;;  %v706_v45 = vpack.c.bf16 %v286_v41, %v285_v40  ;;  %v269_v47 = vld [vmem:[%s1176_s17] sm:$0xff]  ;;  %p899_p12 = por %p898_p9, %p897_p7 }
  0x74   : > { %692 = vmatpush3.bf16.msra.mxu0 %v691_v14  ;;  %714 = vmatprep.subr.bf16.mxu1 %v967_v0  ;;  %v727_v46 = vpack.c.bf16 %v378_v44, %v377_v43  ;;  %v379_v48 = vld [vmem:[#allocation7 + $0x70] sm:$0xff]  ;;  %v380_v49 = vld [vmem:[#allocation7 + $0x78] sm:$0xff] }
  0x75   : > { %693 = vmatprep.subr.bf16.mxu0 %v967_v0  ;;  %v730_v50 = vpack.c.bf16 %v380_v49, %v379_v48  ;;  %v574_v51 = vld [vmem:[%s1261_s2] ss:$0 sm:$0xff]  ;;  %p900_p2 = pnand %p899_p12, %p893_p3 }
  0x76   : > { %v575_v56 = vld [vmem:[%s1263_s4] ss:$0 sm:$0xff] }
  0x77   : > { %716 = vmatpush3.bf16.msra.mxu1 %v715_v24 }
  0x78   : > { %695 = vmatpush3.bf16.msra.mxu0 %v694_v21  ;;  %717 = vmatprep.subr.bf16.mxu1 %v967_v0 }
  0x79   : > { %696 = vmatprep.subr.bf16.mxu0 %v967_v0 }
  0x7b   : > { %719 = vmatpush3.bf16.msra.mxu1 %v718_v30 }
  0x7c   : > { %698 = vmatpush3.bf16.msra.mxu0 %v697_v27  ;;  %720 = vmatprep.subr.bf16.mxu1 %v967_v0 }
  0x7d   : > { %699 = vmatprep.subr.bf16.mxu0 %v967_v0 }
  0x7f   : > { %722 = vmatpush3.bf16.msra.mxu1 %v721_v36 }
  0x80   : > { %701 = vmatpush3.bf16.msra.mxu0 %v700_v33  ;;  %723 = vmatprep.subr.bf16.mxu1 %v967_v0 }
  0x81   : > { %702 = vmatprep.subr.bf16.mxu0 %v967_v0 }
  0x83   : > { %725 = vmatpush3.bf16.msra.mxu1 %v724_v42 }
  0x84   : > { %704 = vmatpush3.bf16.msra.mxu0 %v703_v39  ;;  %726 = vmatprep.subr.bf16.mxu1 %v967_v0 }
  0x85   : > { %705 = vmatprep.subr.bf16.mxu0 %v967_v0 }
  0x87   : > { %728 = vmatpush3.bf16.msra.mxu1 %v727_v46 }
  0x88   : > { %707 = vmatpush3.bf16.msra.mxu0 %v706_v45  ;;  %729 = vmatprep.subr.bf16.mxu1 %v967_v0 }
  0x8b   : > { %647 = vmatmul.mubr.f32.vlgmr.msra.gmra.mrb[0].mxu0 %v269_v47  ;;  %731 = vmatpush3.bf16.msra.mxu1 %v730_v50 }
 0x15e   : > { %v359_v52 = vpop.f32.mrb[0].mxu0 }
 0x15f   : > { %v360_v53 = vadd.f32 %v574_v51, %v359_v52  ;;  %v648_v54 = vpop.f32.mrb[1].mxu0 }
 0x161   : > { %v363_v55 = vmax.f32 %v360_v53, 0.0 }
 0x163   : > { %682 = vmatmul.mubr.f32.vlgmr.msra.gmra.mrb[0].mxu1 %v363_v55 }
 0x236   : > { %v453_v57 = vpop.f32.mrb[0].mxu1 }
 0x237   : > { %v454_v58 = vadd.f32 %v575_v56, %v453_v57  ;;  %v683_v59 = vpop.f32.mrb[1].mxu1 }
 0x239   : > { %v457_v60 = vmax.f32 %v454_v58, 0.0 }
 0x23b   : > { %458 = vst [vmem:[%s268_s28] sm:$0xff] %v457_v60 }
 0x23c   : > { %903 = shalt.err (!%p900_p2)
}
 0x23d   : > { %s904_s12 = scalar_lea.hbm %s1215_s15, 128  ;;  %s908_s26 = scalar_lea.hbm %s1264_s5, 256 }
 0x23e   : > { %p905_p13 = scmp.ne.s32.totalorder %s1215_s15, %s904_s12  ;;  %p909_p4 = scmp.lt.u32.totalorder %s1215_s15, %s1264_s5 }
 0x23f   : > { %p910_p5 = scmp.lt.u32.totalorder %s908_s26, %s904_s12  ;;  %p912_p11 = scmp.lt.u32.totalorder %s904_s12, %s1215_s15 }
 0x240   : > { %p906_p6 = pnand %p905_p13, %p1278_p0 }
 0x241   : > { %p911_p8 = por %p910_p5, %p909_p4 }
 0x242   : > { %p907_p10 = pneg %p906_p6 }
 0x243   : > { %p913_p1 = por %p912_p11, %p911_p8 }
 0x245   : > { %p914_p3 = pnand %p913_p1, %p907_p10 }
 0x247   : > { %917 = shalt.err (!%p914_p3)
}
 0x248   : > { %742 = dma.vmem_to_hbm [thread:$0]  (%p1278_p0), %s1217_s7, 128, %s1215_s15, %s460_s16  }
 0x249 PF: > { %s485_s11 = sand.u32 1, %s948_s18   ;;  %p1279_p7 = scmp.ne.s32.totalorder %s1269_s25, 0 }
 0x24a   : > { %p1280_p9 = scmp.ge.s32.totalorder %s960_s21, 2  ;;  %s486_s28 = scalar_lea.sflag [#allocation4], %s485_s11 }
 0x24c   : > { %p756_p12 = pnand %p1280_p9, %p1279_p7 }
 0x24e   : > { %943 = dma.done.wait (!%p756_p12), %s486_s28, 128  }
 0x24f   : > { %945 = vsyncadd (!%p756_p12), %s486_s28, 4294967168  ;;  %p19_p2 = scmp.ge.s32.totalorder %s1111_s14, 4   ;;  %s1281_s18 = smov %s952_s19 }
 0x250   : > { %s1282_s19 = smov %s956_s20  ;;  %s1283_s20 = smov %s1127_s27 }
 0x251   : > { %s1284_s21 = smov %s1111_s14  ;;  %21 = sbr.rel (!%p19_p2) target bundleno = 6 (0x6), region = 93 }
 0x258   :  { %491 = vsyncpa [#allocation3], 1 }
 0x259   :  { %493 = vsyncpa [#allocation3 + $0x1], 1 }
 0x25a   :  { %494 = vsyncpa [#allocation6], 1 }
 0x25b   :  { %495 = vsyncpa [#allocation4], 1 }
 0x25c   :  { %497 = vsyncpa [#allocation4 + $0x1], 1 }

</bundles_post_ra>
